<compile_context>
chip_gen: v5e
topology: v5e:2x2
jax: 0.10.0
libtpu: 0.0.40
codegen_flags: <defaults>
</compile_context>

<pallas_src>
import jax
import jax.numpy as jnp
from jax.experimental import pallas as pl
from jax.experimental.pallas import tpu as pltpu


# ----------------------------------------------------------------------------
# Pallas kernel: perturb -> score_fn (split 1x1 conv) -> squared error ->
# per-block lane-dense partial sum.
# ----------------------------------------------------------------------------
def _psld_loss_kernel(coef_ref, x_ref, ex_ref, em_ref, wx_ref, wm_ref, out_ref):
    cf = coef_ref[...]          # (Rblk, 8) per-row coefficient table
    x0 = x_ref[...]             # (Rblk, HW)
    ex = ex_ref[...]            # (Rblk, HW)  eps_x rows
    em = em_ref[...]            # (Rblk, HW)  eps_m rows

    e_xx = cf[:, 0:1]           # per-row scalars, broadcast along lanes
    e_mx = cf[:, 1:2]
    l11 = cf[:, 2:3]
    l21 = cf[:, 3:4]
    l22 = cf[:, 4:5]
    bias = cf[:, 5:6]           # bias_t[:,0] + bias_t[:,1]*t, precomputed per row

    # PSLD perturbation with m_0 == 0 (hsm mode):
    #   x_t = E00 * x0 + L00 * eps_x
    #   m_t = E10 * x0 + L10 * eps_x + L11 * eps_m
    x_t = e_xx * x0 + l11 * ex
    m_t = e_mx * x0 + l21 * ex + l22 * em

    # Synthetic score network (1x1 conv) split over the two channel halves:
    # block-diagonal weights keep the batch-in-sublane layout a dense matmul.
    pred = jnp.dot(wx_ref[...], x_t, preferred_element_type=jnp.float32)
    pred = pred + jnp.dot(wm_ref[...], m_t, preferred_element_type=jnp.float32)
    pred = pred + bias

    # score_m / lower decomposition: target is eps_m.
    diff = em - pred
    # Only a sublane reduce here; lane reduce + mean finish in JAX.
    out_ref[...] = jnp.sum(diff * diff, axis=0, keepdims=True)   # (1, HW)


def _pick_block_b(B, C, HW):
    """Largest divisor of B whose (block_b*C, HW) f32 tiles keep the three
    double-buffered input streams (and the (Rblk,Rblk) block-diagonal conv
    weight) comfortably inside the portable scoped-VMEM defaults
    (16 MiB v5e / 32 MiB v6e,v7x)."""
    max_rows = max(C, min(512, (2 << 20) // (HW * 4)))
    return max(d for d in range(1, B + 1) if B % d == 0 and d * C <= max_rows)


def psld_score_loss_pallas(x_0, eps, t, coefs, w, bias_t):
    """Returns mean((eps_m - score_fn(z_t, t))^2) like PSLDScoreLoss.forward
    (training.mode='hsm', sde.mode='score_m', decomp_mode='lower')."""
    B, C, H, W = x_0.shape
    HW = H * W
    R = B * C

    block_b = _pick_block_b(B, C, HW)
    Rblk = block_b * C
    G = B // block_b

    # Batch folded into the sublane axis.
    x2d = x_0.reshape(R, HW).astype(jnp.float32)
    eps4 = eps.reshape(B, 2, C, HW)
    ex2d = eps4[:, 0].reshape(R, HW).astype(jnp.float32)
    em2d = eps4[:, 1].reshape(R, HW).astype(jnp.float32)

    # Per-row coefficient table: [E00, E10, L00, L10, L11, bias_eff, 0, 0].
    # (E01/E11 never enter: m_0 == 0 in hsm mode.)
    per_sample = jnp.stack(
        [coefs[:, 0], coefs[:, 2], coefs[:, 4], coefs[:, 5], coefs[:, 6]],
        axis=1).astype(jnp.float32)                                   # (B, 5)
    bias_eff = (bias_t[None, :, 0] + bias_t[None, :, 1] * t[:, None]) # (B, C)
    row_coefs = jnp.concatenate(
        [jnp.repeat(per_sample, C, axis=0),          # (R, 5)
         bias_eff.reshape(R, 1).astype(jnp.float32), # (R, 1)
         jnp.zeros((R, 2), jnp.float32)], axis=1)    # -> (R, 8)

    # Split 1x1-conv weights and expand to block-diagonal over the per-block
    # batch so the batch-in-sublane layout is one dense matmul per term.
    wx = w[:, :C].astype(jnp.float32)
    wm = w[:, C:].astype(jnp.float32)
    eye_b = jnp.eye(block_b, dtype=jnp.float32)
    wx_blk = jnp.kron(eye_b, wx)                     # (Rblk, Rblk)
    wm_blk = jnp.kron(eye_b, wm)                     # (Rblk, Rblk)

    partials = pl.pallas_call(
        _psld_loss_kernel,
        out_shape=jax.ShapeDtypeStruct((G, HW), jnp.float32),
        grid=(G,),
        in_specs=[
            pl.BlockSpec((Rblk, 8), lambda g: (g, 0)),
            pl.BlockSpec((Rblk, HW), lambda g: (g, 0)),
            pl.BlockSpec((Rblk, HW), lambda g: (g, 0)),
            pl.BlockSpec((Rblk, HW), lambda g: (g, 0)),
            pl.BlockSpec((Rblk, Rblk), lambda g: (0, 0)),
            pl.BlockSpec((Rblk, Rblk), lambda g: (0, 0)),
        ],
        out_specs=pl.BlockSpec((1, HW), lambda g: (g, 0)),
        compiler_params=pltpu.CompilerParams(
            dimension_semantics=("parallel",)),
    )(row_coefs, x2d, ex2d, em2d, wx_blk, wm_blk)

    # reduce_strategy == 'mean' over the eps_m-shaped loss tensor.
    return jnp.sum(partials) / (B * C * HW)


# ----------------------------------------------------------------------------
# Glue: synthetic PSLD SDE coefficients (per-sample scalar 2x2 math)
# ----------------------------------------------------------------------------
def psld_coefficients(t, *, mm_0, xx_0=0.0, beta0=0.1, beta1=20.0,
                      gamma=0.01, nu=4.01, m_inv=4.0):
    """PSLD-style perturbation kernel: mean matrix exp(-0.5*B(t)*A) and the
    Cholesky factor of the perturbation covariance. Shape: (B, 8) scalars
    [E00, E01, E10, E11, L00, L10, L11, t]."""
    # TODO(synk): exact PSLD variance uses the Lyapunov solution of the coupled
    # SDE; here we use the standard stationary-interpolation form (synthetic sde).
    B_t = beta0 * t + 0.5 * (beta1 - beta0) * t ** 2
    A = jnp.array([[gamma, -m_inv], [1.0, nu]], dtype=jnp.float32)
    sig_inf = jnp.array([[1.0, 0.0], [0.0, 1.0 / m_inv]], dtype=jnp.float32)
    sig_0 = jnp.array([[xx_0, 0.0], [0.0, mm_0]], dtype=jnp.float32)

    def per_t(bt):
        E = jax.scipy.linalg.expm(-0.5 * bt * A)
        sig = sig_inf - E @ (sig_inf - sig_0) @ E.T
        s11 = jnp.maximum(sig[0, 0], 1e-8)
        l11 = jnp.sqrt(s11)
        l21 = sig[1, 0] / l11
        l22 = jnp.sqrt(jnp.maximum(sig[1, 1] - l21 ** 2, 1e-8))
        return jnp.stack([E[0, 0], E[0, 1], E[1, 0], E[1, 1], l11, l21, l22])

    coefs = jax.vmap(per_t)(B_t.astype(jnp.float32))
    return jnp.concatenate([coefs, t.astype(jnp.float32)[:, None]], axis=1)


# ----------------------------------------------------------------------------
# Pure-JAX reference (same math, no Pallas) for a sanity check
# ----------------------------------------------------------------------------
def psld_score_loss_ref(x_0, eps, t, coefs, w, bias_t):
    B, C, H, W = x_0.shape
    HW = H * W
    x = x_0.reshape(B, C, HW)
    e = eps.reshape(B, 2 * C, HW)
    e_x, e_m = e[:, :C], e[:, C:]
    cs = coefs
    # training.mode == 'hsm' -> m_0 == 0
    x_t = cs[:, 0, None, None] * x + cs[:, 4, None, None] * e_x
    m_t = (cs[:, 2, None, None] * x + cs[:, 5, None, None] * e_x
           + cs[:, 6, None, None] * e_m)
    z_t = jnp.concatenate([x_t, m_t], axis=1)
    pred = jnp.einsum('ck,bkh->bch', w, z_t)
    pred = pred + bias_t[None, :, 0:1] + bias_t[None, :, 1:2] * t[:, None, None]
    return jnp.mean((e_m - pred) ** 2)


if __name__ == "__main__":
    B, C, H, W = 2, 4, 16, 16
    mm_0 = 0.25  # sde.mm_0

    key = jax.random.PRNGKey(0)
    k_x, k_eps, k_t, k_w, k_b = jax.random.split(key, 5)

    x_0 = jax.random.normal(k_x, (B, C, H, W), dtype=jnp.float32)
    # training.mode == 'hsm' -> m_0 = zeros_like(x_0); never materialized.
    eps = jax.random.normal(k_eps, (B, 2 * C, H, W), dtype=jnp.float32)
    t = jax.random.uniform(k_t, (B,), minval=1e-3, maxval=1.0, dtype=jnp.float32)

    # Deterministic synthetic score_fn parameters (1x1 conv: 2C -> C).
    w = 0.1 * jax.random.normal(k_w, (C, 2 * C), dtype=jnp.float32)
    bias_t = 0.05 * jax.random.normal(k_b, (C, 2), dtype=jnp.float32)

    coefs = psld_coefficients(t, mm_0=mm_0)

    loss = psld_score_loss_pallas(x_0, eps, t, coefs, w, bias_t)
    jax.block_until_ready(loss)

    ref = psld_score_loss_ref(x_0, eps, t, coefs, w, bias_t)
    assert jnp.allclose(loss, ref, rtol=2e-3, atol=2e-3), (loss, ref)

    print("KERNEL_OK")
</pallas_src>

<mosaic_0001>
module attributes {stable_mosaic.version = 11 : i64} {
  func.func @_psld_loss_kernel(%arg0: i32, %arg1: memref<8x8xf32, #tpu.memory_space<vmem>>, %arg2: memref<8x256xf32, #tpu.memory_space<vmem>>, %arg3: memref<8x256xf32, #tpu.memory_space<vmem>>, %arg4: memref<8x256xf32, #tpu.memory_space<vmem>>, %arg5: memref<8x8xf32, #tpu.memory_space<vmem>>, %arg6: memref<8x8xf32, #tpu.memory_space<vmem>>, %arg7: memref<1x256xf32, #tpu.memory_space<vmem>>) attributes {dimension_semantics = [#tpu.dimension_semantics<parallel>], iteration_bounds = array<i64: 1>, scalar_prefetch = 0 : i64, scratch_operands = 0 : i64, tpu.core_type = #tpu.core_type<tc>, window_params = [{transform_indices = @transform_0, window_bounds = array<i64: 8, 8>}, {transform_indices = @transform_1, window_bounds = array<i64: 8, 256>}, {transform_indices = @transform_2, window_bounds = array<i64: 8, 256>}, {transform_indices = @transform_3, window_bounds = array<i64: 8, 256>}, {pipeline_mode = #tpu.pipeline_mode<synchronous>, transform_indices = @transform_4, window_bounds = array<i64: 8, 8>}, {pipeline_mode = #tpu.pipeline_mode<synchronous>, transform_indices = @transform_5, window_bounds = array<i64: 8, 8>}, {transform_indices = @transform_6, window_bounds = array<i64: 1, 256>}]} {
    %c0 = arith.constant 0 : index
    %c0_0 = arith.constant 0 : index
    %0 = vector.load %arg1[%c0, %c0_0] : memref<8x8xf32, #tpu.memory_space<vmem>>, vector<8x8xf32>
    %c0_1 = arith.constant 0 : index
    %c0_2 = arith.constant 0 : index
    %1 = vector.load %arg2[%c0_1, %c0_2] : memref<8x256xf32, #tpu.memory_space<vmem>>, vector<8x256xf32>
    %c0_3 = arith.constant 0 : index
    %c0_4 = arith.constant 0 : index
    %2 = vector.load %arg3[%c0_3, %c0_4] : memref<8x256xf32, #tpu.memory_space<vmem>>, vector<8x256xf32>
    %c0_5 = arith.constant 0 : index
    %c0_6 = arith.constant 0 : index
    %3 = vector.load %arg4[%c0_5, %c0_6] : memref<8x256xf32, #tpu.memory_space<vmem>>, vector<8x256xf32>
    %4 = vector.extract_strided_slice %0 {offsets = [0, 0], sizes = [8, 1], strides = [1, 1]} : vector<8x8xf32> to vector<8x1xf32>
    %5 = vector.extract_strided_slice %0 {offsets = [0, 1], sizes = [8, 1], strides = [1, 1]} : vector<8x8xf32> to vector<8x1xf32>
    %6 = vector.extract_strided_slice %0 {offsets = [0, 2], sizes = [8, 1], strides = [1, 1]} : vector<8x8xf32> to vector<8x1xf32>
    %7 = vector.extract_strided_slice %0 {offsets = [0, 3], sizes = [8, 1], strides = [1, 1]} : vector<8x8xf32> to vector<8x1xf32>
    %8 = vector.extract_strided_slice %0 {offsets = [0, 4], sizes = [8, 1], strides = [1, 1]} : vector<8x8xf32> to vector<8x1xf32>
    %9 = vector.extract_strided_slice %0 {offsets = [0, 5], sizes = [8, 1], strides = [1, 1]} : vector<8x8xf32> to vector<8x1xf32>
    %10 = vector.broadcast %4 : vector<8x1xf32> to vector<8x256xf32>
    %11 = arith.mulf %10, %1 : vector<8x256xf32>
    %12 = vector.broadcast %6 : vector<8x1xf32> to vector<8x256xf32>
    %13 = arith.mulf %12, %2 : vector<8x256xf32>
    %14 = arith.addf %11, %13 : vector<8x256xf32>
    %15 = vector.broadcast %5 : vector<8x1xf32> to vector<8x256xf32>
    %16 = arith.mulf %15, %1 : vector<8x256xf32>
    %17 = vector.broadcast %7 : vector<8x1xf32> to vector<8x256xf32>
    %18 = arith.mulf %17, %2 : vector<8x256xf32>
    %19 = arith.addf %16, %18 : vector<8x256xf32>
    %20 = vector.broadcast %8 : vector<8x1xf32> to vector<8x256xf32>
    %21 = arith.mulf %20, %3 : vector<8x256xf32>
    %22 = arith.addf %19, %21 : vector<8x256xf32>
    %c0_7 = arith.constant 0 : index
    %c0_8 = arith.constant 0 : index
    %23 = vector.load %arg5[%c0_7, %c0_8] : memref<8x8xf32, #tpu.memory_space<vmem>>, vector<8x8xf32>
    %cst = arith.constant dense<0.000000e+00> : vector<8x256xf32>
    %24 = tpu.matmul %23, %14, %cst {dimension_numbers = #tpu.dot_dimension_numbers<[1], [0], [0], [1], [0, 0, 1, 1], [], []>} : vector<8x8xf32>, vector<8x256xf32>, vector<8x256xf32> -> vector<8x256xf32>
    %c0_9 = arith.constant 0 : index
    %c0_10 = arith.constant 0 : index
    %25 = vector.load %arg6[%c0_9, %c0_10] : memref<8x8xf32, #tpu.memory_space<vmem>>, vector<8x8xf32>
    %cst_11 = arith.constant dense<0.000000e+00> : vector<8x256xf32>
    %26 = tpu.matmul %25, %22, %cst_11 {dimension_numbers = #tpu.dot_dimension_numbers<[1], [0], [0], [1], [0, 0, 1, 1], [], []>} : vector<8x8xf32>, vector<8x256xf32>, vector<8x256xf32> -> vector<8x256xf32>
    %27 = arith.addf %24, %26 : vector<8x256xf32>
    %28 = vector.broadcast %9 : vector<8x1xf32> to vector<8x256xf32>
    %29 = arith.addf %27, %28 : vector<8x256xf32>
    %30 = arith.subf %3, %29 : vector<8x256xf32>
    %31 = arith.mulf %30, %30 : vector<8x256xf32>
    %cst_12 = arith.constant dense<0.000000e+00> : vector<256xf32>
    %32 = vector.multi_reduction <add>, %31, %cst_12 [0] : vector<8x256xf32> to vector<256xf32>
    %33 = vector.shape_cast %32 : vector<256xf32> to vector<1x256xf32>
    %c0_13 = arith.constant 0 : index
    %c0_14 = arith.constant 0 : index
    %34 = vector.load %arg7[%c0_13, %c0_14] : memref<1x256xf32, #tpu.memory_space<vmem>>, vector<1x256xf32>
    tpu.vector_store %arg7[%c0_13, %c0_14], %33 {strides = array<i32>} : memref<1x256xf32, #tpu.memory_space<vmem>>, vector<1x256xf32>,
    return
  }
  func.func @transform_0(%arg0: i32) -> (i32, i32) {
    %c0_i32 = arith.constant 0 : i32
    %c0_i32_0 = arith.constant 0 : i32
    return %arg0, %c0_i32 : i32, i32
  }
  func.func @transform_1(%arg0: i32) -> (i32, i32) {
    %c0_i32 = arith.constant 0 : i32
    %c0_i32_0 = arith.constant 0 : i32
    return %arg0, %c0_i32 : i32, i32
  }
  func.func @transform_2(%arg0: i32) -> (i32, i32) {
    %c0_i32 = arith.constant 0 : i32
    %c0_i32_0 = arith.constant 0 : i32
    return %arg0, %c0_i32 : i32, i32
  }
  func.func @transform_3(%arg0: i32) -> (i32, i32) {
    %c0_i32 = arith.constant 0 : i32
    %c0_i32_0 = arith.constant 0 : i32
    return %arg0, %c0_i32 : i32, i32
  }
  func.func @transform_4(%arg0: i32) -> (i32, i32) {
    %c0_i32 = arith.constant 0 : i32
    %c0_i32_0 = arith.constant 0 : i32
    %c0_i32_1 = arith.constant 0 : i32
    return %c0_i32, %c0_i32_0 : i32, i32
  }
  func.func @transform_5(%arg0: i32) -> (i32, i32) {
    %c0_i32 = arith.constant 0 : i32
    %c0_i32_0 = arith.constant 0 : i32
    %c0_i32_1 = arith.constant 0 : i32
    return %c0_i32, %c0_i32_0 : i32, i32
  }
  func.func @transform_6(%arg0: i32) -> (i32, i32) {
    %c0_i32 = arith.constant 0 : i32
    %c0_i32_0 = arith.constant 0 : i32
    return %arg0, %c0_i32 : i32, i32
  }
}

</mosaic_0001>

<bundles_post_ra>
// kernel: tpu_custom_call.1
= control target key start
LH: loop header
LB: loop body
LE: loop exit
PB: predicated region body
PF: predicated region fallthrough
CT: control target
= control target key end

     0   :  { %11 = vsyncpa [#allocation3], 0  ;;  %s567_s0 = inlined_call_operand.hbm [shape: f32[8,8], index: 0, kind: input, shape index: {}]   ;;  %s568_s1 = inlined_call_operand.hbm [shape: f32[8,256], index: 1, kind: input, shape index: {}]   ;;  %s569_s2 = inlined_call_operand.hbm [shape: f32[8,256], index: 2, kind: input, shape index: {}]   ;;  %s570_s3 = inlined_call_operand.hbm [shape: f32[8,256], index: 3, kind: input, shape index: {}]   ;;  %s571_s4 = inlined_call_operand.hbm [shape: f32[8,8], index: 4, kind: input, shape index: {}]   ;;  %s572_s5 = inlined_call_operand.hbm [shape: f32[8,8], index: 5, kind: input, shape index: {}]   ;;  %s573_s6 = inlined_call_operand.hbm [shape: f32[1,256], index: 6, kind: output, shape index: {}]  }
   0x1   :  { %12 = vsyncpa [#allocation6], 0 }
   0x2   :  { %13 = vsyncpa [#allocation9], 0 }
   0x3   :  { %14 = vsyncpa [#allocation12], 0  ;;  %s32_s23 = sshll.u32 %s568_s1, 4  ;;  %s33_s23 = int_to_ptr.hbm [resolvable:$true] %s32_s23 }
   0x4   :  { %15 = vsyncpa [#allocation4], 0  ;;  %s494_s24 = smov [#allocation5]   ;;  %s54_s28 = sshll.u32 %s570_s3, 4  ;;  %s55_s28 = int_to_ptr.hbm [resolvable:$true] %s54_s28 }
   0x5   :  { %s34_s25 = sshll.u32 %s494_s24, 4  ;;  %s495_s29 = smov [#allocation8]   ;;  %s35_s25 = int_to_ptr.vmem [resolvable:$true] %s34_s25 }
   0x6   :  { %37 = dma.hbm_to_vmem [thread:$0]  %s33_s23, 256, %s35_s25, [#allocation6]  }
   0x7   :  { %s56_s30 = sshll.u32 %s495_s29, 4  ;;  %s21_s9 = sshll.u32 %s567_s0, 4  ;;  %s57_s30 = int_to_ptr.vmem [resolvable:$true] %s56_s30  ;;  %s22_s9 = int_to_ptr.hbm [resolvable:$true] %s21_s9 }
   0x8   :  { %59 = dma.hbm_to_vmem [thread:$0]  %s55_s28, 256, %s57_s30, [#allocation9]  }
   0x9   :  { %s43_s11 = sshll.u32 %s569_s2, 4  ;;  %s496_s12 = smov [#allocation2]   ;;  %s44_s11 = int_to_ptr.hbm [resolvable:$true] %s43_s11 }
   0xa   :  { %s23_s13 = sshll.u32 %s496_s12, 4  ;;  %s497_s3 = smov [#allocation7]   ;;  %s24_s13 = int_to_ptr.vmem [resolvable:$true] %s23_s13 }
   0xb   :  { %26 = dma.hbm_to_vmem [thread:$0]  %s22_s9, 128, %s24_s13, [#allocation3]  }
   0xc   :  { %s45_s14 = sshll.u32 %s497_s3, 4  ;;  %s65_s17 = sshll.u32 %s571_s4, 4  ;;  %s46_s14 = int_to_ptr.vmem [resolvable:$true] %s45_s14  ;;  %s66_s17 = int_to_ptr.hbm [resolvable:$true] %s65_s17 }
   0xd   :  { %48 = dma.hbm_to_vmem [thread:$0]  %s44_s11, 256, %s46_s14, [#allocation6]  }
   0xe   :  { %s76_s19 = sshll.u32 %s572_s5, 4  ;;  %s498_s20 = smov [#allocation10]   ;;  %s77_s19 = int_to_ptr.hbm [resolvable:$true] %s76_s19 }
   0xf   :  { %s67_s2 = sshll.u32 %s498_s20, 4  ;;  %s499_s21 = smov [#allocation11]   ;;  %s68_s2 = int_to_ptr.vmem [resolvable:$true] %s67_s2 }
  0x10   :  { %70 = dma.hbm_to_vmem [thread:$0]  %s66_s17, 128, %s68_s2, [#allocation9]  }
  0x11   :  { %s78_s22 = sshll.u32 %s499_s21, 4  ;;  %s79_s22 = int_to_ptr.vmem [resolvable:$true] %s78_s22 }
  0x12   :  { %81 = dma.hbm_to_vmem [thread:$0]  %s77_s19, 128, %s79_s22, [#allocation12]  }
  0x13   :  { %484 = dma.done.wait [#allocation3], 128  }
  0x14   :  { %485 = vsyncadd [#allocation3], 4294967168 }
  0x15   :  { %486 = dma.done.wait [#allocation6], 512  }
  0x16   :  { %487 = vsyncadd [#allocation6], 4294966784 }
  0x17   :  { %488 = dma.done.wait [#allocation9], 384  }
  0x18   :  { %489 = vsyncadd [#allocation9], 4294966912 }
  0x19   :  { %490 = dma.done.wait [#allocation12], 128  }
  0x1a   :  { %491 = vsyncadd [#allocation12], 4294967168  ;;  %v500_v0 = vmov 1   ;;  %v501_v1 = vmov 0   ;;  %v502_v2 = vmov 4   ;;  %v106_v3 = vld [vmem:[#allocation2] sm:$0xff]  ;;  %v267_v59 = vlaneseq }
  0x1b   :  { %311 = vset.pattern.permute.xlu1 %v500_v0  ;;  %309 = vset.pattern.permute.xlu0 %v501_v1  ;;  %v503_v4 = vmov 3   ;;  %v504_v5 = vmov 2   ;;  %v505_v6 = vmov 5   ;;  %v111_v9 = vld [vmem:[#allocation8] sm:$0xff]  ;;  %v112_v10 = vld [vmem:[#allocation8 + $0x8] sm:$0xff]  ;;  %v109_v14 = vld [vmem:[#allocation7] sm:$0xff] }
  0x1c   :  { %313 = vset.pattern.permute.xlu2 %v502_v2  ;;  %129 = vperm.xlu1 %311, %v106_v3   ;;  %v107_v12 = vld [vmem:[#allocation5] sm:$0xff]  ;;  %v108_v13 = vld [vmem:[#allocation5 + $0x8] sm:$0xff]  ;;  %v110_v15 = vld [vmem:[#allocation7 + $0x8] sm:$0xff]  ;;  %vm152_vm0 = vcmask 64512   ;;  %s506_s4 = smov [#allocation13]   ;;  %s279_s25 = sshll.u32 %s573_s6, 4  ;;  %s280_s25 = int_to_ptr.hbm [resolvable:$true] %s279_s25 }
  0x1d   :  { %115 = vperm.xlu0 %309, %v106_v3   ;;  %143 = vperm.xlu2 %313, %v106_v3   ;;  %v150_v30 = vld [vmem:[#allocation10] sm:$0xff]  ;;  %v151_v35 = vld [vmem:[#allocation11] sm:$0xff]  ;;  %s277_s5 = sshll.u32 %s506_s4, 4  ;;  %vm264_vm1 = vcmask 1040384   ;;  %vm269_vm2 = vcmp.lt.s32.totalorder %v267_v59, 256  ;;  %s278_s5 = int_to_ptr.vmem [resolvable:$true] %s277_s5 }
  0x24   :  { %312 = vset.pattern.permute.xlu1 %v503_v4 }
  0x25   :  { %310 = vset.pattern.permute.xlu0 %v504_v5  ;;  %135 = vperm.xlu1 %312, %v106_v3  }
  0x26   :  { %121 = vperm.xlu0 %310, %v106_v3   ;;  %314 = vset.pattern.permute.xlu2 %v505_v6 }
  0x27   :  { %240 = vperm.xlu2 %314, %v106_v3  }
  0x2e   :  { %315 = vset.pattern.permute.xlu0 %v505_v6 }
  0x77   :  { %v144_v11 = vpop.permute.xlu2 %143 }
  0x78   :  { %v146_v16 = vmul.f32 %v144_v11, %v111_v9  ;;  %v147_v17 = vmul.f32 %v144_v11, %v112_v10 }
  0x81   :  { %v241_v38 = vpop.permute.xlu2 %240 }
  0x8e   :  { %v130_v8 = vpop.permute.xlu1 %129 }
  0x8f   :  { %v116_v7 = vpop.permute.xlu0 %115  ;;  %v132_v20 = vmul.f32 %v130_v8, %v107_v12  ;;  %v133_v21 = vmul.f32 %v130_v8, %v108_v13 }
  0x90   :  { %v118_v18 = vmul.f32 %v116_v7, %v107_v12  ;;  %v119_v19 = vmul.f32 %v116_v7, %v108_v13 }
  0x97   :  { %v136_v22 = vpop.permute.xlu1 %135 }
  0x98   :  { %v122_v23 = vpop.permute.xlu0 %121  ;;  %v138_v24 = vmul.f32 %v136_v22, %v109_v14  ;;  %v139_v25 = vmul.f32 %v136_v22, %v110_v15 }
  0x99   :  { %v124_v26 = vmul.f32 %v122_v23, %v109_v14  ;;  %v125_v27 = vmul.f32 %v122_v23, %v110_v15 }
  0x9a   :  { %v140_v31 = vadd.f32 %v138_v24, %v132_v20  ;;  %v141_v32 = vadd.f32 %v139_v25, %v133_v21 }
  0x9b   :  { %v126_v28 = vadd.f32 %v124_v26, %v118_v18  ;;  %v127_v29 = vadd.f32 %v125_v27, %v119_v19 }
  0x9c   :  { %v148_v33 = vadd.f32 %v146_v16, %v140_v31  ;;  %v149_v34 = vadd.f32 %v147_v17, %v141_v32 }
  0x9d   :  { %214 = vmatpush.msra.mxu2 %v126_v28  ;;  %234 = vmatpush.msra.mxu3 %v127_v29 }
  0x9e   :  { %294 = vmatmul.msk.f32.vlgmr.msra.gmra.mxu2 %vm152_vm0, %v150_v30  ;;  %295 = vmatmul.msk.f32.vlgmr.msra.gmra.mxu3 %vm152_vm0, %v150_v30 }
  0x9f   :  { %171 = vmatpush.msra.mxu0 %v148_v33  ;;  %191 = vmatpush.msra.mxu1 %v149_v34 }
  0xa0   :  { %292 = vmatmul.msk.f32.vlgmr.msra.gmra.mxu0 %vm152_vm0, %v151_v35  ;;  %293 = vmatmul.msk.f32.vlgmr.msra.gmra.mxu1 %vm152_vm0, %v151_v35 }
 0x11d   :  { %v173_v36 = vpop.f32.mrf.mxu0  ;;  %v193_v37 = vpop.f32.mrf.mxu1 }
 0x121   :  { %v216_v39 = vpop.f32.mrf.mxu2  ;;  %v236_v40 = vpop.f32.mrf.mxu3 }
 0x122   :  { %v217_v41 = vadd.f32 %v216_v39, %v173_v36  ;;  %v237_v42 = vadd.f32 %v236_v40, %v193_v37 }
 0x124   :  { %v243_v43 = vadd.f32 %v241_v38, %v217_v41  ;;  %v244_v44 = vadd.f32 %v241_v38, %v237_v42 }
 0x126   :  { %v245_v45 = vsub.f32 %v111_v9, %v243_v43  ;;  %v246_v46 = vsub.f32 %v112_v10, %v244_v44 }
 0x128   :  { %v247_v47 = vmul.f32 %v245_v45, %v245_v45  ;;  %v248_v48 = vmul.f32 %v246_v46, %v246_v46 }
 0x12a   :  { %v249_v49 = vrot.slane %v247_v47, 4  ;;  %v255_v50 = vrot.slane %v248_v48, 4 }
 0x12c   :  { %v250_v51 = vadd.f32 %v249_v49, %v247_v47  ;;  %v256_v52 = vadd.f32 %v255_v50, %v248_v48 }
 0x12e   :  { %v251_v53 = vrot.slane %v250_v51, 2  ;;  %v257_v54 = vrot.slane %v256_v52, 2 }
 0x130   :  { %v252_v55 = vadd.f32 %v251_v53, %v250_v51  ;;  %v258_v56 = vadd.f32 %v257_v54, %v256_v52 }
 0x132   :  { %v253_v57 = vrot.slane %v252_v55, 1  ;;  %v259_v58 = vrot.slane %v258_v56, 1 }
 0x134   :  { %v260_v60 = vadd.f32 %v259_v58, %v258_v56  ;;  %v254_v61 = vadd.f32 %v253_v57, %v252_v55 }
 0x136   :  { %v263_v62 = vrot.slane %v260_v60, 7 }
 0x138   :  { %v265_v63 = vsel %vm264_vm1, %v254_v61, %v263_v62 }
 0x139   :  { %271 = vst.msk [vmem:[#allocation13] sm:$0x3] %vm269_vm2, %v265_v63 }
 0x13a   :  { %282 = dma.vmem_to_hbm [thread:$0]  %s278_s5, 32, %s280_s25, [#allocation4]  }
 0x13b   :  { %492 = dma.done.wait [#allocation4], 32  }
 0x13c   :  { %493 = vsyncadd [#allocation4], 4294967264 }
 0x13d   :  { %287 = vsyncpa [#allocation3], 1 }
 0x13e   :  { %288 = vsyncpa [#allocation6], 1 }
 0x13f   :  { %289 = vsyncpa [#allocation9], 1 }
 0x140   :  { %290 = vsyncpa [#allocation12], 1 }
 0x141   :  { %291 = vsyncpa [#allocation4], 1 }

</bundles_post_ra>
